<compile_context>
chip_gen: v7x
topology: tpu7x:2x2x1
jax: 0.10.0
libtpu: 0.0.40
codegen_flags: <defaults>
</compile_context>

<pallas_src>
import jax
import jax.numpy as jnp
from jax import lax
from jax.experimental import pallas as pl
from jax.experimental.pallas import tpu as pltpu


def coplprompt_kernel(valid_ref, x_ref, a_ref, k_ref, pk_ref, pv_ref,
                      ek_ref, ev_ref, aq_ref):
    # ---- per-B-tile prologue: compute cosine-similarity weights once ----
    @pl.when(pl.program_id(1) == 0)
    def _():
        x = x_ref[...].astype(jnp.float32)        # (tm, Dk)
        A = a_ref[...].astype(jnp.float32)        # (F, Dk)
        K = k_ref[...].astype(jnp.float32)        # (F, Dk)
        eps2 = jnp.float32(1e-24)                 # (torch F.normalize eps = 1e-12)^2

        dn = (((1,), (1,)), ((), ()))             # contract over Dk
        # num[b,k] = sum_d x*A*K                  -> (tm, F)   (MXU)
        num = lax.dot_general(x, A * K, dn, preferred_element_type=jnp.float32)
        # ||x (.) A||^2[b,k] = sum_d x^2 * A^2    -> (tm, F)   (MXU)
        den2_aq = lax.dot_general(x * x, A * A, dn,
                                  preferred_element_type=jnp.float32)
        # ||K_k||^2                               -> (1, F)
        den2_k = jnp.sum(K * K, axis=1, keepdims=True).T

        # 1 / max(sqrt(d), eps) == rsqrt(max(d, eps^2))   (EUP, no VPU divide)
        aq = (num
              * lax.rsqrt(jnp.maximum(den2_aq, eps2))
              * lax.rsqrt(jnp.maximum(den2_k, eps2)))

        # mask pool rows beyond the active task range (shapes stay fixed at full pool)
        pool_id = lax.broadcasted_iota(jnp.int32, aq.shape, 1)
        aq_ref[...] = jnp.where(pool_id < valid_ref[0], aq, 0.0)

    # ---- per-(b,n) tile: one MXU push per output half, lane-dense stores ----
    aq = aq_ref[...].astype(pk_ref.dtype)         # bf16 operand for the MXU
    ek_ref[...] = jnp.dot(aq, pk_ref[...], preferred_element_type=jnp.float32)
    ev_ref[...] = jnp.dot(aq, pv_ref[...], preferred_element_type=jnp.float32)


def coplprompt_forward(x_querry, x_block, l, params, *, e_layers, e_p_length,
                       e_pool_size, n_tasks, task_count=0,
                       p_dtype=jnp.bfloat16):
    """Eval-mode forward of CoPLPrompt (train=False). Returns (p_return, loss, x_block)."""
    if l not in e_layers:
        return None, 0.0, x_block

    K_full, A_full, p_full = params[l]            # (pool,Dk), (pool,Dk), (pool,L,De)
    pt = int(e_pool_size / n_tasks)
    f = int((task_count + 1) * pt)                # active rows (eval path uses [0:f])

    B, Dk = x_querry.shape
    Fp, L, De = p_full.shape                      # Fp == e_pool_size (fixed shape)
    assert L % 2 == 0
    Lh = L // 2
    Nh = Lh * De

    # Ek / Ev halves of the prompt pool, flattened lane-dense, stored bf16.
    pk = p_full[:, :Lh, :].reshape(Fp, Nh).astype(p_dtype)
    pv = p_full[:, Lh:, :].reshape(Fp, Nh).astype(p_dtype)

    # Tile sizes: (8,128)-legal (or full-dim), capped so double-buffered blocks stay
    # well under the 32 MiB scoped-VMEM default even on v7x.
    tm = B if B <= 256 else 256
    tn = Nh if Nh <= 1024 else 1024
    nb = pl.cdiv(B, tm)
    nn = pl.cdiv(Nh, tn)

    valid = jnp.array([f], dtype=jnp.int32)       # scalar-prefetched to SMEM

    p_bytes = jnp.dtype(p_dtype).itemsize
    q_bytes = jnp.dtype(x_querry.dtype).itemsize
    cost = pl.CostEstimate(
        flops=2 * B * Dk * Fp * 2 + 2 * B * Fp * L * De,
        transcendentals=2 * B * Fp,
        bytes_accessed=(B * Dk * q_bytes
                        + nb * 2 * Fp * Dk * 4
                        + nb * 2 * Fp * Nh * p_bytes
                        + 2 * B * Nh * 4),
    )

    grid_spec = pltpu.PrefetchScalarGridSpec(
        num_scalar_prefetch=1,
        grid=(nb, nn),                                         # n innermost
        in_specs=[
            pl.BlockSpec((tm, Dk), lambda b, n, v: (b, 0)),    # x
            pl.BlockSpec((Fp, Dk), lambda b, n, v: (0, 0)),    # A
            pl.BlockSpec((Fp, Dk), lambda b, n, v: (0, 0)),    # K
            pl.BlockSpec((Fp, tn), lambda b, n, v: (0, n)),    # p, Ek half
            pl.BlockSpec((Fp, tn), lambda b, n, v: (0, n)),    # p, Ev half
        ],
        out_specs=[
            pl.BlockSpec((tm, tn), lambda b, n, v: (b, n)),    # Ek
            pl.BlockSpec((tm, tn), lambda b, n, v: (b, n)),    # Ev
        ],
        scratch_shapes=[pltpu.VMEM((tm, Fp), jnp.float32)],    # cached aq_k
    )

    Ek_flat, Ev_flat = pl.pallas_call(
        coplprompt_kernel,
        out_shape=(jax.ShapeDtypeStruct((B, Nh), jnp.float32),
                   jax.ShapeDtypeStruct((B, Nh), jnp.float32)),
        grid_spec=grid_spec,
        compiler_params=pltpu.CompilerParams(
            # B axis sharded across TensorCores (v7x megacore); n axis must stay
            # sequential because the aq_k scratch is reused across n tiles.
            dimension_semantics=("parallel", "arbitrary")),
        cost_estimate=cost,
    )(valid, x_querry, A_full, K_full, pk, pv)

    Ek = Ek_flat.reshape(B, Lh, De)
    Ev = Ev_flat.reshape(B, Lh, De)
    loss = 0.0                                    # eval path: no ortho penalty
    return [Ek, Ev], loss, x_block


# ---------------- deterministic parameter init (glue, plain JAX) ----------------

def _gram_schmidt_rows(key, rows, dim):
    # Deterministic stand-in for the module's gram_schmidt on random vectors:
    # orthonormalize `rows` Gaussian vectors of length `dim` (QR == classical GS up to sign).
    v = jax.random.normal(key, (dim, rows), dtype=jnp.float32)
    q, _ = jnp.linalg.qr(v)
    return q.T                                    # (rows, dim), orthonormal rows


def init_coplprompt_params(key, *, emb_d, key_dim, e_pool_size, e_p_length,
                           e_layers, n_tasks, task_count=0):
    pt = int(e_pool_size / n_tasks)
    s, f = task_count * pt, (task_count + 1) * pt
    params = {}
    for e in e_layers:
        key, kp, kk, ka = jax.random.split(key, 4)
        # Rows outside [s:f] stay zero — matches the torch module right after __init__.
        p = jnp.zeros((e_pool_size, e_p_length * emb_d), jnp.float32)
        p = p.at[s:f].set(_gram_schmidt_rows(kp, f - s, e_p_length * emb_d))
        p = p.reshape(e_pool_size, e_p_length, emb_d)
        k = jnp.zeros((e_pool_size, key_dim), jnp.float32)
        k = k.at[s:f].set(_gram_schmidt_rows(kk, f - s, key_dim))
        a = jnp.zeros((e_pool_size, key_dim), jnp.float32)
        a = a.at[s:f].set(_gram_schmidt_rows(ka, f - s, key_dim))
        params[e] = (k, a, p)
    return params


# ---------------- pure-JAX reference (mirrors the torch code) ----------------

def reference_forward(x_querry, K, A, p, e_p_length):
    eps = 1e-12
    a_querry = jnp.einsum('bd,kd->bkd', x_querry, A)
    n_K = K / jnp.maximum(jnp.linalg.norm(K, axis=1, keepdims=True), eps)
    q = a_querry / jnp.maximum(jnp.linalg.norm(a_querry, axis=2, keepdims=True), eps)
    aq_k = jnp.einsum('bkd,kd->bk', q, n_K)
    P_ = jnp.einsum('bk,kld->bld', aq_k, p)
    i = int(e_p_length / 2)
    return P_[:, :i, :], P_[:, i:, :]


if __name__ == "__main__":
    # Small synthetic configuration (module defaults key_dim=emb_d=768 shrunk for the test).
    emb_d = 32
    key_dim = 32
    n_tasks = 2
    e_pool_size = 8          # prompt_param[0]
    e_p_length = 8           # prompt_param[1]
    e_layers = [0, 1, 2, 3, 4, 5, 6]
    task_count = 0
    B = 2

    root = jax.random.PRNGKey(0)
    k_params, k_x, k_blk, k_junk = jax.random.split(root, 4)

    params = init_coplprompt_params(
        k_params, emb_d=emb_d, key_dim=key_dim, e_pool_size=e_pool_size,
        e_p_length=e_p_length, e_layers=e_layers, n_tasks=n_tasks,
        task_count=task_count)

    x_querry = jax.random.normal(k_x, (B, key_dim), dtype=jnp.float32)
    x_block = jax.random.normal(k_blk, (B, 4, emb_d), dtype=jnp.float32)  # pass-through

    layer = 3
    pt = int(e_pool_size / n_tasks)
    f = (task_count + 1) * pt
    K_full, A_full, p_full = params[layer]
    Ek_ref, Ev_ref = reference_forward(x_querry, K_full[:f], A_full[:f], p_full[:f],
                                       e_p_length)

    common = dict(e_layers=e_layers, e_p_length=e_p_length, e_pool_size=e_pool_size,
                  n_tasks=n_tasks, task_count=task_count)

    # 1) default bf16-prompt path (loose tolerance: bf16 storage of p / aq_k operand)
    p_return, loss, xb = coplprompt_forward(x_querry, x_block, layer, params, **common)
    Ek, Ev = p_return
    jax.block_until_ready(Ek)
    jax.block_until_ready(Ev)
    assert Ek.shape == (B, e_p_length // 2, emb_d)
    assert Ev.shape == (B, e_p_length // 2, emb_d)
    assert xb.shape == x_block.shape
    assert jnp.allclose(Ek, Ek_ref, atol=5e-3, rtol=3e-2)
    assert jnp.allclose(Ev, Ev_ref, atol=5e-3, rtol=3e-2)

    # 2) full-precision path matches the torch math tightly
    (Ek32, Ev32), _, _ = coplprompt_forward(x_querry, x_block, layer, params,
                                            p_dtype=jnp.float32, **common)
    jax.block_until_ready(Ek32)
    assert jnp.allclose(Ek32, Ek_ref, atol=1e-5, rtol=1e-5)
    assert jnp.allclose(Ev32, Ev_ref, atol=1e-5, rtol=1e-5)

    # 3) in-kernel pool masking: junk in rows >= f must not change the result
    junk = jax.random.normal(k_junk, (e_pool_size - f,), dtype=jnp.float32)
    K_j = K_full.at[f:].set(jax.random.normal(jax.random.fold_in(k_junk, 1),
                                              (e_pool_size - f, key_dim)))
    A_j = A_full.at[f:].set(jax.random.normal(jax.random.fold_in(k_junk, 2),
                                              (e_pool_size - f, key_dim)))
    p_j = p_full.at[f:].set(jax.random.normal(jax.random.fold_in(k_junk, 3),
                                              (e_pool_size - f, e_p_length, emb_d)))
    params_j = dict(params)
    params_j[layer] = (K_j, A_j, p_j)
    (Ek_m, Ev_m), _, _ = coplprompt_forward(x_querry, x_block, layer, params_j,
                                            p_dtype=jnp.float32, **common)
    jax.block_until_ready(Ek_m)
    assert jnp.allclose(Ek_m, Ek_ref, atol=1e-5, rtol=1e-5)
    assert jnp.allclose(Ev_m, Ev_ref, atol=1e-5, rtol=1e-5)

    # 4) non-prompt layer pass-through
    pr, ls, xb2 = coplprompt_forward(x_querry, x_block, 10, params, **common)
    assert pr is None and ls == 0.0 and xb2.shape == x_block.shape

    # TODO(synk): train-path ortho_penalty loss, gram_schmidt re-init on process_task_count,
    # and align_patch_and_prompt are not on the eval forward hot path and are left to plain JAX.
    print("KERNEL_OK")
</pallas_src>

<mosaic_0001>
module attributes {stable_mosaic.version = 11 : i64} {
  func.func @coplprompt_kernel(%arg0: i32, %arg1: i32, %arg2: memref<1xi32, #tpu.memory_space<smem>>, %arg3: memref<2x32xf32, #tpu.memory_space<vmem>>, %arg4: memref<8x32xf32, #tpu.memory_space<vmem>>, %arg5: memref<8x32xf32, #tpu.memory_space<vmem>>, %arg6: memref<8x128xbf16, #tpu.memory_space<vmem>>, %arg7: memref<8x128xbf16, #tpu.memory_space<vmem>>, %arg8: memref<2x128xf32, #tpu.memory_space<vmem>>, %arg9: memref<2x128xf32, #tpu.memory_space<vmem>>, %arg10: memref<2x8xf32, #tpu.memory_space<vmem>>) attributes {dimension_semantics = [#tpu.dimension_semantics<parallel>, #tpu.dimension_semantics<arbitrary>], iteration_bounds = array<i64: 1, 1>, scalar_prefetch = 1 : i64, scratch_operands = 1 : i64, tpu.core_type = #tpu.core_type<tc>, window_params = [{transform_indices = @transform_0, window_bounds = array<i64: 2, 32>}, {pipeline_mode = #tpu.pipeline_mode<synchronous>, transform_indices = @transform_1, window_bounds = array<i64: 8, 32>}, {pipeline_mode = #tpu.pipeline_mode<synchronous>, transform_indices = @transform_2, window_bounds = array<i64: 8, 32>}, {transform_indices = @transform_3, window_bounds = array<i64: 8, 128>}, {transform_indices = @transform_4, window_bounds = array<i64: 8, 128>}, {transform_indices = @transform_5, window_bounds = array<i64: 2, 128>}, {transform_indices = @transform_6, window_bounds = array<i64: 2, 128>}]} {
    %c0_i32 = arith.constant 0 : i32
    %0 = arith.cmpi eq, %arg1, %c0_i32 : i32
    %1 = arith.extui %0 : i1 to i32
    %c0_i32_0 = arith.constant 0 : i32
    %2 = arith.cmpi ne, %1, %c0_i32_0 : i32
    scf.if %2 {
      %c0_11 = arith.constant 0 : index
      %c0_12 = arith.constant 0 : index
      %11 = vector.load %arg3[%c0_11, %c0_12] : memref<2x32xf32, #tpu.memory_space<vmem>>, vector<2x32xf32>
      %c0_13 = arith.constant 0 : index
      %c0_14 = arith.constant 0 : index
      %12 = vector.load %arg4[%c0_13, %c0_14] : memref<8x32xf32, #tpu.memory_space<vmem>>, vector<8x32xf32>
      %c0_15 = arith.constant 0 : index
      %c0_16 = arith.constant 0 : index
      %13 = vector.load %arg5[%c0_15, %c0_16] : memref<8x32xf32, #tpu.memory_space<vmem>>, vector<8x32xf32>
      %14 = arith.mulf %12, %13 : vector<8x32xf32>
      %cst_17 = arith.constant dense<0.000000e+00> : vector<2x8xf32>
      %15 = tpu.matmul %11, %14, %cst_17 {dimension_numbers = #tpu.dot_dimension_numbers<[1], [1], [0], [0], [0, 0, 1, 0], [], []>} : vector<2x32xf32>, vector<8x32xf32>, vector<2x8xf32> -> vector<2x8xf32>
      %16 = arith.mulf %11, %11 : vector<2x32xf32>
      %17 = arith.mulf %12, %12 : vector<8x32xf32>
      %cst_18 = arith.constant dense<0.000000e+00> : vector<2x8xf32>
      %18 = tpu.matmul %16, %17, %cst_18 {dimension_numbers = #tpu.dot_dimension_numbers<[1], [1], [0], [0], [0, 0, 1, 0], [], []>} : vector<2x32xf32>, vector<8x32xf32>, vector<2x8xf32> -> vector<2x8xf32>
      %19 = arith.mulf %13, %13 : vector<8x32xf32>
      %cst_19 = arith.constant dense<0.000000e+00> : vector<8xf32>
      %20 = vector.multi_reduction <add>, %19, %cst_19 [1] : vector<8x32xf32> to vector<8xf32>
      %21 = vector.shape_cast %20 : vector<8xf32> to vector<8x1xf32>
      %22 = tpu.transpose %21, [1, 0] : vector<8x1xf32> -> vector<1x8xf32>
      %cst_20 = arith.constant 1.000000e-24 : f32
      %23 = vector.broadcast %cst_20 : f32 to vector<2x8xf32>
      %24 = arith.maximumf %18, %23 : vector<2x8xf32>
      %25 = math.rsqrt %24 : vector<2x8xf32>
      %26 = arith.mulf %15, %25 : vector<2x8xf32>
      %cst_21 = arith.constant 1.000000e-24 : f32
      %27 = vector.broadcast %cst_21 : f32 to vector<1x8xf32>
      %28 = arith.maximumf %22, %27 : vector<1x8xf32>
      %29 = math.rsqrt %28 : vector<1x8xf32>
      %30 = vector.broadcast %29 : vector<1x8xf32> to vector<2x8xf32>
      %31 = arith.mulf %26, %30 : vector<2x8xf32>
      %32 = tpu.iota {dimensions = array<i32: 1>} : vector<2x8xi32>
      %c0_22 = arith.constant 0 : index
      %33 = memref.load %arg2[%c0_22] : memref<1xi32, #tpu.memory_space<smem>>
      %34 = vector.broadcast %33 : i32 to vector<2x8xi32>
      %35 = arith.cmpi slt, %32, %34 : vector<2x8xi32>
      %cst_23 = arith.constant 0.000000e+00 : f32
      %36 = vector.broadcast %cst_23 : f32 to vector<2x8xf32>
      %37 = arith.select %35, %31, %36 : vector<2x8xi1>, vector<2x8xf32>
      %c0_24 = arith.constant 0 : index
      %c0_25 = arith.constant 0 : index
      %38 = vector.load %arg10[%c0_24, %c0_25] : memref<2x8xf32, #tpu.memory_space<vmem>>, vector<2x8xf32>
      tpu.vector_store %arg10[%c0_24, %c0_25], %37 {strides = array<i32>} : memref<2x8xf32, #tpu.memory_space<vmem>>, vector<2x8xf32>,
    } else {
    }
    %c0 = arith.constant 0 : index
    %c0_1 = arith.constant 0 : index
    %3 = vector.load %arg10[%c0, %c0_1] : memref<2x8xf32, #tpu.memory_space<vmem>>, vector<2x8xf32>
    %4 = arith.truncf %3 : vector<2x8xf32> to vector<2x8xbf16>
    %c0_2 = arith.constant 0 : index
    %c0_3 = arith.constant 0 : index
    %5 = vector.load %arg6[%c0_2, %c0_3] : memref<8x128xbf16, #tpu.memory_space<vmem>>, vector<8x128xbf16>
    %cst = arith.constant dense<0.000000e+00> : vector<2x128xf32>
    %6 = tpu.matmul %4, %5, %cst {dimension_numbers = #tpu.dot_dimension_numbers<[1], [0], [0], [1], [0, 0, 1, 1], [], []>} : vector<2x8xbf16>, vector<8x128xbf16>, vector<2x128xf32> -> vector<2x128xf32>
    %c0_4 = arith.constant 0 : index
    %c0_5 = arith.constant 0 : index
    %7 = vector.load %arg8[%c0_4, %c0_5] : memref<2x128xf32, #tpu.memory_space<vmem>>, vector<2x128xf32>
    tpu.vector_store %arg8[%c0_4, %c0_5], %6 {strides = array<i32>} : memref<2x128xf32, #tpu.memory_space<vmem>>, vector<2x128xf32>,
    %c0_6 = arith.constant 0 : index
    %c0_7 = arith.constant 0 : index
    %8 = vector.load %arg7[%c0_6, %c0_7] : memref<8x128xbf16, #tpu.memory_space<vmem>>, vector<8x128xbf16>
    %cst_8 = arith.constant dense<0.000000e+00> : vector<2x128xf32>
    %9 = tpu.matmul %4, %8, %cst_8 {dimension_numbers = #tpu.dot_dimension_numbers<[1], [0], [0], [1], [0, 0, 1, 1], [], []>} : vector<2x8xbf16>, vector<8x128xbf16>, vector<2x128xf32> -> vector<2x128xf32>
    %c0_9 = arith.constant 0 : index
    %c0_10 = arith.constant 0 : index
    %10 = vector.load %arg9[%c0_9, %c0_10] : memref<2x128xf32, #tpu.memory_space<vmem>>, vector<2x128xf32>
    tpu.vector_store %arg9[%c0_9, %c0_10], %9 {strides = array<i32>} : memref<2x128xf32, #tpu.memory_space<vmem>>, vector<2x128xf32>,
    return
  }
  func.func @transform_0(%arg0: i32, %arg1: i32, %arg2: memref<1xi32, #tpu.memory_space<smem>>) -> (i32, i32) {
    %c0_i32 = arith.constant 0 : i32
    %c0_i32_0 = arith.constant 0 : i32
    return %arg0, %c0_i32 : i32, i32
  }
  func.func @transform_1(%arg0: i32, %arg1: i32, %arg2: memref<1xi32, #tpu.memory_space<smem>>) -> (i32, i32) {
    %c0_i32 = arith.constant 0 : i32
    %c0_i32_0 = arith.constant 0 : i32
    %c0_i32_1 = arith.constant 0 : i32
    return %c0_i32, %c0_i32_0 : i32, i32
  }
  func.func @transform_2(%arg0: i32, %arg1: i32, %arg2: memref<1xi32, #tpu.memory_space<smem>>) -> (i32, i32) {
    %c0_i32 = arith.constant 0 : i32
    %c0_i32_0 = arith.constant 0 : i32
    %c0_i32_1 = arith.constant 0 : i32
    return %c0_i32, %c0_i32_0 : i32, i32
  }
  func.func @transform_3(%arg0: i32, %arg1: i32, %arg2: memref<1xi32, #tpu.memory_space<smem>>) -> (i32, i32) {
    %c0_i32 = arith.constant 0 : i32
    %c0_i32_0 = arith.constant 0 : i32
    return %c0_i32, %arg1 : i32, i32
  }
  func.func @transform_4(%arg0: i32, %arg1: i32, %arg2: memref<1xi32, #tpu.memory_space<smem>>) -> (i32, i32) {
    %c0_i32 = arith.constant 0 : i32
    %c0_i32_0 = arith.constant 0 : i32
    return %c0_i32, %arg1 : i32, i32
  }
  func.func @transform_5(%arg0: i32, %arg1: i32, %arg2: memref<1xi32, #tpu.memory_space<smem>>) -> (i32, i32) {
    %c0_i32 = arith.constant 0 : i32
    return %arg0, %arg1 : i32, i32
  }
  func.func @transform_6(%arg0: i32, %arg1: i32, %arg2: memref<1xi32, #tpu.memory_space<smem>>) -> (i32, i32) {
    %c0_i32 = arith.constant 0 : i32
    return %arg0, %arg1 : i32, i32
  }
}

</mosaic_0001>

<bundles_post_ra>
// kernel: tpu_custom_call.1
= control target key start
LH: loop header
LB: loop body
LE: loop exit
PB: predicated region body
PF: predicated region fallthrough
CT: control target
= control target key end

     0   :  { %14 = vsyncpa [#allocation6], 0  ;;  %s606_s0 = inlined_call_operand.<no memory space> [shape: s32[1], index: 0, kind: input, shape index: {}]   ;;  %s607_s1 = inlined_call_operand.vmem [shape: f32[2,32], index: 1, kind: input, shape index: {}]   ;;  %s608_s2 = inlined_call_operand.hbm [shape: f32[8,32], index: 2, kind: input, shape index: {}]   ;;  %s609_s3 = inlined_call_operand.vmem [shape: f32[8,32], index: 3, kind: input, shape index: {}]   ;;  %s610_s4 = inlined_call_operand.vmem [shape: bf16[8,128], index: 4, kind: input, shape index: {}]   ;;  %s611_s5 = inlined_call_operand.vmem [shape: bf16[8,128], index: 5, kind: input, shape index: {}]   ;;  %s612_s6 = inlined_call_operand.hbm [shape: f32[2,128], index: 6, kind: output, shape index: {0}]   ;;  %s613_s7 = inlined_call_operand.hbm [shape: f32[2,128], index: 7, kind: output, shape index: {1}]  }
   0x1   :  { %15 = vsyncpa [#allocation7], 0 }
   0x2   :  { %16 = vsyncpa [#allocation10], 0  ;;  %s499_s24 = smov [#allocation5]   ;;  %s427_s28 = scalar_lea.hbm %s608_s2, 128 }
   0x3   :  { %s25_s25 = sshll.u32 %s499_s24, 4  ;;  %p428_p0 = scmp.ne.s32.totalorder %s608_s2, %s427_s28  ;;  %s26_s25 = int_to_ptr.vmem [resolvable:$true] %s25_s25 }
   0x4   :  { %p431_p1 = scmp.lt.u32.totalorder %s427_s28, %s608_s2 }
   0x6   :  { %p433_p2 = pnand %p431_p1, %p428_p0 }
   0x8   :  { %436 = shalt.err (!%p433_p2)
}
   0x9   :  { %s437_s10 = scalar_lea.vmem %s26_s25, 128  ;;  %p442_p4 = scmp.lt.s32.totalorder %s26_s25, %s26_s25 }
   0xa   :  { %p438_p3 = scmp.ne.s32.totalorder %s26_s25, %s437_s10  ;;  %p443_p5 = scmp.lt.s32.totalorder %s437_s10, %s437_s10 }
   0xc   :  { %p444_p6 = por %p443_p5, %p442_p4 }
   0xe   :  { %p445_p7 = pnand %p444_p6, %p438_p3 }
  0x10   :  { %448 = shalt.err (!%p445_p7)
}
  0x11   :  { %28 = dma.hbm_to_vmem [thread:$0]  %s608_s2, 128, %s26_s25, [#allocation6]  }
  0x12   :  { %493 = dma.done.wait [#allocation6], 128  }
  0x13   :  { %494 = vsyncadd [#allocation6], 4294967168  ;;  %v500_v0 = vmov 0.0   ;;  %vm501_vm0 = vmmov 0   ;;  %v45_v1 = vld [vmem:[%s609_s3] sm:$0xff]  ;;  %vm47_vm1 = vcmask 261120   ;;  %v243_v23 = vlaneseq }
  0x14   :  { %401 = vmatprep.subr.mxu1 %v500_v0  ;;  %403 = vmatprep.mubr.msk.f32.mxu1 %vm501_vm0, %v500_v0  ;;  %v44_v2 = vld [vmem:[#allocation5] sm:$0xff]  ;;  %v43_v3 = vld [vmem:[%s607_s1] sm:$0x3]  ;;  %v202_v4 = vmul.f32 %v45_v1, %v45_v1  ;;  %vm263_vm2 = vcmask 1043456   ;;  %v251_v27 = vstv %s606_s0  ;;  %vm254_vm4 = vcmask 58368   ;;  %s502_s18 = smov [#allocation8]  }
  0x15   :  { %396 = vmatprep.subr.mxu0 %v500_v0  ;;  %398 = vmatprep.mubr.msk.f32.mxu0 %vm501_vm0, %v500_v0  ;;  %v46_v5 = vmul.f32 %v45_v1, %v44_v2  ;;  %v125_v6 = vmul.f32 %v44_v2, %v44_v2  ;;  %v124_v7 = vmul.f32 %v43_v3, %v43_v3  ;;  %v258_v10 = vld [vmem:[%s610_s4] sm:$0xf]  ;;  %v244_v24 = vshrl.u32 %v243_v23, 7  ;;  %s359_s19 = sshll.u32 %s502_s18, 4  ;;  %s503_s20 = smov [#allocation9]   ;;  %s360_s19 = int_to_ptr.vmem [resolvable:$true] %s359_s19 }
  0x16   :  { %v203_v8 = vsel %vm47_vm1, %v202_v4, 0.0  ;;  %v308_v11 = vld [vmem:[%s611_s5] sm:$0xf]  ;;  %v265_v12 = vsel %vm263_vm2, %v258_v10, 0  ;;  %v249_v26 = vand.u32 127, %v243_v23  ;;  %vm259_vm5 = vcmask 64512   ;;  %p454_p9 = scmp.lt.s32.totalorder %s360_s19, %s360_s19 }
  0x17   :  { %402 = vmatpush3.xpose.msk.msra.mxu1 %vm47_vm1, %v125_v6  ;;  %397 = vmatpush3.xpose.msk.msra.mxu0 %vm47_vm1, %v46_v5  ;;  %v310_v13 = vsel %vm263_vm2, %v308_v11, 0  ;;  %v245_v25 = vsub.s32 0, %v244_v24  ;;  %s369_s21 = sshll.u32 %s503_s20, 4  ;;  %s449_s0 = scalar_lea.vmem %s360_s19, 32  ;;  %s575_s21 = int_to_ptr.vmem [resolvable:$true] %s369_s21 }
  0x18   :  { %204 = vadd.xlane.f32.xlu0 %v203_v8  ;;  %406 = vmatprep.subr.bf16.mxu0 %v500_v0  ;;  %vm252_vm3 = vcmp.lt.s32.totalorder %v249_v26, %v251_v27  ;;  %p450_p8 = scmp.ne.s32.totalorder %s360_s19, %s449_s0  ;;  %p455_p10 = scmp.lt.s32.totalorder %s449_s0, %s449_s0 }
  0x19   :  { %412 = vmatprep.subr.bf16.mxu1 %v500_v0 }
  0x1a   :  { %404 = vmatmul.mubr.msk.f32.vlgmr.msra.gmra.mrb[0].mxu1 %vm47_vm1, %v124_v7  ;;  %399 = vmatmul.mubr.msk.f32.vlgmr.msra.gmra.mrb[0].mxu0 %vm47_vm1, %v43_v3  ;;  %p456_p11 = por %p455_p10, %p454_p9 }
  0x1b   :  { %408 = vmatprep.mubr.msk.bf16.mxu0 %vm501_vm0, %v500_v0  ;;  %414 = vmatprep.mubr.msk.bf16.mxu1 %vm501_vm0, %v500_v0 }
  0x1c   :  { %407 = vmatpush3.bf16.msra.mxu0 %v265_v12  ;;  %413 = vmatpush3.bf16.msra.mxu1 %v310_v13  ;;  %p457_p12 = pnand %p456_p11, %p450_p8 }
  0xa5   :  { %v205_v9 = vpop.xlane.xlu0 %204 }
  0xa6   :  { %206 = vxpose.xlu0.b32.start.end [1/1] (short) (narrow) %v205_v9, 8 }
  0xed   :  { %v198_v14 = vpop.f32.mrb[0].mxu1  ;;  %v120_v15 = vpop.f32.mrb[0].mxu0 }
  0xee   :  { %v238_v16 = vmax.f32 %v198_v14, 1e-24  ;;  %v405_v17 = vpop.f32.mrb[1].mxu1  ;;  %v400_v18 = vpop.f32.mrb[1].mxu0 }
  0xf0   :  { %423 = vrsqrt.f32 %v238_v16 }
  0xfa   :  { %v424_v19 = vpop.eup %423 }
  0xfb   :  { %v240_v20 = vmul.f32 %v424_v19, %v120_v15 }
 0x126   :  { %v222_v21 = vpop.trf.xlu0 }
 0x127   :  { %v241_v22 = vmax.f32 %v222_v21, 1e-24 }
 0x129   :  { %425 = vrsqrt.f32 %v241_v22 }
 0x133   :  { %v426_v28 = vpop.eup %425 }
 0x134   :  { %v246_v29 = vrot.slane %v426_v28, %v245_v25 }
 0x136   :  { %v247_v30 = vmul.f32 %v246_v29, %v240_v20 }
 0x138   :  { %v253_v31 = vsel %vm252_vm3, %v247_v30, 0.0 }
 0x139   :  { %255 = vst.msk [vmem:[#allocation2] sm:$0x3] %vm254_vm4, %v253_v31 }
 0x140   :  { %v256_v32 = vld [vmem:[#allocation2] sm:$0x3] }
 0x141   :  { %v257_v33 = vpack.c.bf16 %v256_v32, %v256_v32 }
 0x143   :  { %409 = vmatmul.mubr.msk.bf16.vlgmr.msra.gmra.mrb[4].mxu0 %vm259_vm5, %v257_v33  ;;  %415 = vmatmul.mubr.msk.bf16.vlgmr.msra.gmra.mrb[4].mxu1 %vm259_vm5, %v257_v33 }
 0x216   :  { %v301_v34 = vpop.f32.mrb[4].mxu0  ;;  %v346_v35 = vpop.f32.mrb[4].mxu1 }
 0x217   :  { %307 = vst [vmem:[#allocation8] sm:$0x3] %v301_v34  ;;  %352 = vst [vmem:[#allocation9] sm:$0x3] %v346_v35  ;;  %v410_v36 = vpop.f32.mrb[5].mxu0  ;;  %v416_v37 = vpop.f32.mrb[5].mxu1 }
 0x218   :  { %v304_v38 = vpop.f32.mrb[6].mxu0  ;;  %v349_v39 = vpop.f32.mrb[6].mxu1 }
 0x219   :  { %460 = shalt.err (!%p457_p12)
}
 0x21a   :  { %s461_s24 = scalar_lea.hbm %s612_s6, 32 }
 0x21b   :  { %p462_p13 = scmp.ne.s32.totalorder %s612_s6, %s461_s24  ;;  %p465_p0 = scmp.lt.u32.totalorder %s461_s24, %s612_s6 }
 0x21d   :  { %p467_p1 = pnand %p465_p0, %p462_p13 }
 0x21f   :  { %470 = shalt.err (!%p467_p1)
}
 0x220   :  { %362 = dma.vmem_to_hbm [thread:$0]  %s360_s19, 32, %s612_s6, [#allocation7]   ;;  %v411_v40 = vpop.f32.mrb[7].mxu0  ;;  %v417_v41 = vpop.f32.mrb[7].mxu1 }
 0x221   :  { %s471_s8 = scalar_lea.vmem %s575_s21, 32  ;;  %p476_p3 = scmp.lt.s32.totalorder %s575_s21, %s575_s21 }
 0x222   :  { %p472_p2 = scmp.ne.s32.totalorder %s575_s21, %s471_s8  ;;  %p477_p4 = scmp.lt.s32.totalorder %s471_s8, %s471_s8 }
 0x224   :  { %p478_p5 = por %p477_p4, %p476_p3 }
 0x226   :  { %p479_p6 = pnand %p478_p5, %p472_p2 }
 0x228   :  { %482 = shalt.err (!%p479_p6)
}
 0x229   :  { %s483_s11 = scalar_lea.hbm %s613_s7, 32 }
 0x22a   :  { %p484_p7 = scmp.ne.s32.totalorder %s613_s7, %s483_s11  ;;  %p487_p8 = scmp.lt.u32.totalorder %s483_s11, %s613_s7 }
 0x22c   :  { %p489_p9 = pnand %p487_p8, %p484_p7 }
 0x22e   :  { %492 = shalt.err (!%p489_p9)
}
 0x22f   :  { %372 = dma.vmem_to_hbm [thread:$0]  %s575_s21, 32, %s613_s7, [#allocation10]  }
 0x230   :  { %495 = dma.done.wait [#allocation7], 32  }
 0x231   :  { %496 = vsyncadd [#allocation7], 4294967264 }
 0x232   :  { %497 = dma.done.wait [#allocation10], 32  }
 0x233   :  { %498 = vsyncadd [#allocation10], 4294967264 }
 0x234   :  { %379 = vsyncpa [#allocation6], 1 }
 0x235   :  { %380 = vsyncpa [#allocation7], 1 }
 0x236   :  { %381 = vsyncpa [#allocation10], 1 }

</bundles_post_ra>
